<compile_context>
chip_gen: v7x
topology: tpu7x:2x2x1
jax: 0.10.0
libtpu: 0.0.40
codegen_flags: <defaults>
</compile_context>

<pallas_src>
import functools

import jax
import jax.numpy as jnp
from jax.experimental import pallas as pl
from jax.experimental.pallas import tpu as pltpu

_LANES = 128
_SUBLANES = 8


def _classification_head_kernel(x_ref, w_ref, b_ref, o_ref):
    """Fused LayerNorm + Linear for one (token_tile, batch_group) grid step.

    x_ref: (Bb, Tt, E)        input tile
    w_ref: (E, C_pad)         gamma-folded linear weight (lane padded)
    b_ref: (1, C_pad)  f32    beta-folded linear bias (lane padded)
    o_ref: (Tt, Bb * C_pad)   output block; batch j writes lanes [j*C_pad, (j+1)*C_pad)
    """
    Bb, Tt, E = x_ref.shape
    C_pad = b_ref.shape[-1]

    # Flatten (batch, token) into one tall M so a single MXU dot covers all Bb rows.
    x = x_ref[...].astype(jnp.float32).reshape(Bb * Tt, E)

    # LayerNorm stats in f32 (biased variance, eps inside rsqrt). The affine
    # (gamma, beta) is folded into w/b in the wrapper, so only center + scale here.
    mean = jnp.mean(x, axis=-1, keepdims=True)
    xc = x - mean
    var = jnp.mean(xc * xc, axis=-1, keepdims=True)
    x_hat = xc * jax.lax.rsqrt(var + 1e-5)

    # Single flat 2-D MXU dot with f32 accumulation; operands stay in the weight dtype.
    y = jnp.dot(x_hat.astype(w_ref.dtype), w_ref[...],
                preferred_element_type=jnp.float32)
    y = (y + b_ref[...].astype(jnp.float32)).astype(o_ref.dtype)     # (Bb*Tt, C_pad)

    # transpose(0, 1) realized via the output layout: each batch element of this
    # group writes a *static*, full 128-lane-aligned slab (unmasked stores).
    for j in range(Bb):
        o_ref[:, j * C_pad:(j + 1) * C_pad] = y[j * Tt:(j + 1) * Tt, :]


def _vmem_capacity_bytes():
    """Physical VMEM per core (128 MiB v5e/v6e, 64 MiB v7x); conservative fallback."""
    try:
        info = pltpu.get_tpu_info()
        cap = int(getattr(info, "vmem_capacity_bytes", 0))
        if cap > 0:
            return cap
    except Exception:
        pass
    return 64 * 1024 * 1024


def _largest_divisor_at_most(n, cap):
    for d in range(min(n, cap), 0, -1):
        if n % d == 0:
            return d
    return 1


@functools.partial(
    jax.jit, static_argnames=("token_tile", "batch_block", "cast_matmul_to_bf16"))
def classification_head(x, gamma, beta, w, b, *,
                        token_tile=None, batch_block=None,
                        cast_matmul_to_bf16=False):
    """x: (B, T, E); gamma/beta: (E,); w: (E, C); b: (C,)  ->  (T, B, C)."""
    B, T, E = x.shape
    E_w, C = w.shape
    assert E_w == E, (E_w, E)

    # ---- Fold the LayerNorm affine into the Linear (done once, in f32). ----
    #   ((x-mu)*rsqrt(var+eps)*gamma + beta) @ W + b
    #     == ((x-mu)*rsqrt(var+eps)) @ (gamma[:,None]*W) + (beta @ W + b)
    w_dtype = w.dtype
    w32 = w.astype(jnp.float32)
    w_folded = gamma.astype(jnp.float32)[:, None] * w32
    b_folded = beta.astype(jnp.float32) @ w32 + b.astype(jnp.float32)
    if cast_matmul_to_bf16 and w_dtype == jnp.float32:
        # v5e: MXU has no native f32 path; bf16 operands + f32 accumulation.
        w_dtype = jnp.bfloat16
    w_folded = w_folded.astype(w_dtype)

    # Lane-pad the class dim so every output store is a full, unmasked (8,128) tile.
    C_pad = ((C + _LANES - 1) // _LANES) * _LANES
    if C_pad != C:
        w_folded = jnp.pad(w_folded, ((0, 0), (0, C_pad - C)))
        b_folded = jnp.pad(b_folded, (0, C_pad - C))
    b_folded = b_folded.reshape(1, C_pad)

    # ---- Batch blocking: Bb batch elements per grid step (static slab writes). ----
    bb_cap = 8 if batch_block is None else max(1, int(batch_block))
    Bb = _largest_divisor_at_most(B, bb_cap)

    # ---- Token tile sized from the per-generation VMEM budget. ----
    x_bytes = jnp.dtype(x.dtype).itemsize
    o_bytes = jnp.dtype(x.dtype).itemsize
    w_bytes = jnp.dtype(w_dtype).itemsize
    vmem_cap = _vmem_capacity_bytes()
    tile_budget = int(vmem_cap * 0.6)                       # leave pipeline headroom
    vmem_limit = min(int(vmem_cap * 0.9), 128 * 1024 * 1024)

    if token_tile is None:
        fixed = 2 * E * C_pad * w_bytes + 2 * C_pad * 4     # resident weight + bias
        per_row = 2 * Bb * E * x_bytes + 2 * Bb * C_pad * o_bytes   # double-buffered
        Tt = (tile_budget - fixed) // max(per_row, 1)
        Tt = max(_SUBLANES, min(int(Tt), 1024))
    else:
        Tt = max(_SUBLANES, int(token_tile))
    if Tt >= T:
        Tt = T                                              # full-dim block is allowed
    else:
        Tt = max(_SUBLANES, (Tt // _SUBLANES) * _SUBLANES)

    grid = (pl.cdiv(T, Tt), B // Bb)

    out_flat = pl.pallas_call(
        _classification_head_kernel,
        out_shape=jax.ShapeDtypeStruct((T, B * C_pad), x.dtype),
        grid=grid,
        in_specs=[
            pl.BlockSpec((Bb, Tt, E), lambda t, bg: (bg, t, 0)),
            pl.BlockSpec((E, C_pad), lambda t, bg: (0, 0)),   # constant -> fetched once
            pl.BlockSpec((1, C_pad), lambda t, bg: (0, 0)),
        ],
        # Each (t, bg) step owns a distinct output block (no revisit), so both grid
        # axes are "parallel" and megacore (v7x: 2 TCs) can shard either one.
        out_specs=pl.BlockSpec((Tt, Bb * C_pad), lambda t, bg: (t, bg)),
        compiler_params=pltpu.CompilerParams(
            dimension_semantics=("parallel", "parallel"),
            vmem_limit_bytes=vmem_limit,
        ),
    )(x, w_folded, b_folded)

    out = out_flat.reshape(T, B, C_pad)
    if C_pad != C:
        # NOTE: consumers that tolerate a lane-padded class dim can skip this slice
        # (saves one extra HBM round-trip); kept to match the module's exact contract.
        out = out[..., :C]
    return out


def _reference(x, gamma, beta, w, b):
    """Pure-JAX reference replicating the PyTorch forward (f32 math)."""
    x32 = x.astype(jnp.float32)
    mean = jnp.mean(x32, axis=-1, keepdims=True)
    var = jnp.mean((x32 - mean) ** 2, axis=-1, keepdims=True)
    x_hat = (x32 - mean) / jnp.sqrt(var + 1e-5)
    x_hat = x_hat * gamma.astype(jnp.float32) + beta.astype(jnp.float32)
    y = x_hat @ w.astype(jnp.float32) + b.astype(jnp.float32)
    return jnp.transpose(y, (1, 0, 2))


def _make_inputs(key, B, T, E, C, dtype):
    kx, kg, kbt, kw, kb = jax.random.split(key, 5)
    x = jax.random.normal(kx, (B, T, E), dtype=jnp.float32).astype(dtype)
    gamma = (1.0 + 0.01 * jax.random.normal(kg, (E,), dtype=jnp.float32)).astype(dtype)
    beta = (0.01 * jax.random.normal(kbt, (E,), dtype=jnp.float32)).astype(dtype)
    # torch Linear stores weight as (C, E); pre-transposed to (E, C) for the kernel.
    w = (jax.random.normal(kw, (E, C), dtype=jnp.float32) / jnp.sqrt(E)).astype(dtype)
    b = (0.01 * jax.random.normal(kb, (C,), dtype=jnp.float32)).astype(dtype)
    return x, gamma, beta, w, b


if __name__ == "__main__":
    # Case 1: module-scale shapes (batch, seq_len, emb_size) = (2, 8, 32), 16 classes.
    B, T, E, C = 2, 8, 32, 16
    x, gamma, beta, w, b = _make_inputs(jax.random.PRNGKey(0), B, T, E, C, jnp.float32)
    out = jax.block_until_ready(classification_head(x, gamma, beta, w, b))
    ref = _reference(x, gamma, beta, w, b)
    assert out.shape == (T, B, C), out.shape
    assert jnp.allclose(out.astype(jnp.float32), ref, atol=5e-5, rtol=1e-5), "case 1"

    # Case 2: multiple token tiles AND batch groups (grid 4x2), Bb=2 slab writes.
    B, T, E, C = 4, 32, 32, 16
    x, gamma, beta, w, b = _make_inputs(jax.random.PRNGKey(1), B, T, E, C, jnp.float32)
    out = jax.block_until_ready(
        classification_head(x, gamma, beta, w, b, token_tile=8, batch_block=2))
    ref = _reference(x, gamma, beta, w, b)
    assert out.shape == (T, B, C), out.shape
    assert jnp.allclose(out.astype(jnp.float32), ref, atol=5e-5, rtol=1e-5), "case 2"

    # Case 3: partial final token tile (T=24, Tt=16) with single-batch groups.
    B, T, E, C = 2, 24, 32, 16
    x, gamma, beta, w, b = _make_inputs(jax.random.PRNGKey(2), B, T, E, C, jnp.float32)
    out = jax.block_until_ready(
        classification_head(x, gamma, beta, w, b, token_tile=16, batch_block=1))
    ref = _reference(x, gamma, beta, w, b)
    assert out.shape == (T, B, C), out.shape
    assert jnp.allclose(out.astype(jnp.float32), ref, atol=5e-5, rtol=1e-5), "case 3"

    # Case 4: bf16 inputs/weights (bf16 MXU operands, f32 LN stats + accumulation).
    B, T, E, C = 2, 16, 64, 16
    x, gamma, beta, w, b = _make_inputs(jax.random.PRNGKey(3), B, T, E, C, jnp.bfloat16)
    out = jax.block_until_ready(classification_head(x, gamma, beta, w, b))
    ref = _reference(x, gamma, beta, w, b)
    assert out.shape == (T, B, C), out.shape
    assert jnp.allclose(out.astype(jnp.float32), ref, atol=1e-1, rtol=5e-2), "case 4"

    # Case 5: v5e-style bf16 MXU operands for f32 weights (opt-in flag).
    B, T, E, C = 2, 8, 32, 16
    x, gamma, beta, w, b = _make_inputs(jax.random.PRNGKey(0), B, T, E, C, jnp.float32)
    out = jax.block_until_ready(
        classification_head(x, gamma, beta, w, b, cast_matmul_to_bf16=True))
    ref = _reference(x, gamma, beta, w, b)
    assert out.shape == (T, B, C), out.shape
    assert jnp.allclose(out.astype(jnp.float32), ref, atol=5e-2, rtol=5e-2), "case 5"

    print("KERNEL_OK")
</pallas_src>

<mosaic_0001>
module attributes {stable_mosaic.version = 11 : i64} {
  func.func @_classification_head_kernel(%arg0: i32, %arg1: i32, %arg2: memref<2x8x32xf32, #tpu.memory_space<vmem>>, %arg3: memref<32x128xf32, #tpu.memory_space<vmem>>, %arg4: memref<1x128xf32, #tpu.memory_space<vmem>>, %arg5: memref<8x256xf32, #tpu.memory_space<vmem>>) attributes {dimension_semantics = [#tpu.dimension_semantics<parallel>, #tpu.dimension_semantics<parallel>], iteration_bounds = array<i64: 1, 1>, scalar_prefetch = 0 : i64, scratch_operands = 0 : i64, tpu.core_type = #tpu.core_type<tc>, window_params = [{transform_indices = @transform_0, window_bounds = array<i64: 2, 8, 32>}, {pipeline_mode = #tpu.pipeline_mode<synchronous>, transform_indices = @transform_1, window_bounds = array<i64: 32, 128>}, {pipeline_mode = #tpu.pipeline_mode<synchronous>, transform_indices = @transform_2, window_bounds = array<i64: 1, 128>}, {transform_indices = @transform_3, window_bounds = array<i64: 8, 256>}]} {
    %c0 = arith.constant 0 : index
    %c0_0 = arith.constant 0 : index
    %c0_1 = arith.constant 0 : index
    %0 = vector.load %arg2[%c0, %c0_0, %c0_1] : memref<2x8x32xf32, #tpu.memory_space<vmem>>, vector<2x8x32xf32>
    %1 = vector.shape_cast %0 : vector<2x8x32xf32> to vector<16x32xf32>
    %cst = arith.constant dense<0.000000e+00> : vector<16xf32>
    %2 = vector.multi_reduction <add>, %1, %cst [1] : vector<16x32xf32> to vector<16xf32>
    %3 = vector.shape_cast %2 : vector<16xf32> to vector<16x1xf32>
    %cst_2 = arith.constant 3.200000e+01 : f32
    %4 = vector.broadcast %cst_2 : f32 to vector<16x1xf32>
    %5 = arith.divf %3, %4 : vector<16x1xf32>
    %6 = vector.broadcast %5 : vector<16x1xf32> to vector<16x32xf32>
    %7 = arith.subf %1, %6 : vector<16x32xf32>
    %8 = arith.mulf %7, %7 : vector<16x32xf32>
    %cst_3 = arith.constant dense<0.000000e+00> : vector<16xf32>
    %9 = vector.multi_reduction <add>, %8, %cst_3 [1] : vector<16x32xf32> to vector<16xf32>
    %10 = vector.shape_cast %9 : vector<16xf32> to vector<16x1xf32>
    %cst_4 = arith.constant 3.200000e+01 : f32
    %11 = vector.broadcast %cst_4 : f32 to vector<16x1xf32>
    %12 = arith.divf %10, %11 : vector<16x1xf32>
    %cst_5 = arith.constant 9.99999974E-6 : f32
    %13 = vector.broadcast %cst_5 : f32 to vector<16x1xf32>
    %14 = arith.addf %12, %13 : vector<16x1xf32>
    %15 = math.rsqrt %14 : vector<16x1xf32>
    %16 = vector.broadcast %15 : vector<16x1xf32> to vector<16x32xf32>
    %17 = arith.mulf %7, %16 : vector<16x32xf32>
    %c0_6 = arith.constant 0 : index
    %c0_7 = arith.constant 0 : index
    %18 = vector.load %arg3[%c0_6, %c0_7] : memref<32x128xf32, #tpu.memory_space<vmem>>, vector<32x128xf32>
    %cst_8 = arith.constant dense<0.000000e+00> : vector<16x128xf32>
    %19 = tpu.matmul %17, %18, %cst_8 {dimension_numbers = #tpu.dot_dimension_numbers<[1], [0], [0], [1], [0, 0, 1, 1], [], []>} : vector<16x32xf32>, vector<32x128xf32>, vector<16x128xf32> -> vector<16x128xf32>
    %c0_9 = arith.constant 0 : index
    %c0_10 = arith.constant 0 : index
    %20 = vector.load %arg4[%c0_9, %c0_10] : memref<1x128xf32, #tpu.memory_space<vmem>>, vector<1x128xf32>
    %21 = vector.broadcast %20 : vector<1x128xf32> to vector<16x128xf32>
    %22 = arith.addf %19, %21 : vector<16x128xf32>
    %23 = vector.extract_strided_slice %22 {offsets = [0, 0], sizes = [8, 128], strides = [1, 1]} : vector<16x128xf32> to vector<8x128xf32>
    %c0_11 = arith.constant 0 : index
    %c0_12 = arith.constant 0 : index
    %24 = vector.load %arg5[%c0_11, %c0_12] : memref<8x256xf32, #tpu.memory_space<vmem>>, vector<8x128xf32>
    tpu.vector_store %arg5[%c0_11, %c0_12], %23 {strides = array<i32>} : memref<8x256xf32, #tpu.memory_space<vmem>>, vector<8x128xf32>,
    %25 = vector.extract_strided_slice %22 {offsets = [8, 0], sizes = [8, 128], strides = [1, 1]} : vector<16x128xf32> to vector<8x128xf32>
    %c0_13 = arith.constant 0 : index
    %c128 = arith.constant 128 : index
    %26 = vector.load %arg5[%c0_13, %c128] : memref<8x256xf32, #tpu.memory_space<vmem>>, vector<8x128xf32>
    tpu.vector_store %arg5[%c0_13, %c128], %25 {strides = array<i32>} : memref<8x256xf32, #tpu.memory_space<vmem>>, vector<8x128xf32>,
    return
  }
  func.func @transform_0(%arg0: i32, %arg1: i32) -> (i32, i32, i32) {
    %c0_i32 = arith.constant 0 : i32
    %c0_i32_0 = arith.constant 0 : i32
    return %arg1, %arg0, %c0_i32 : i32, i32, i32
  }
  func.func @transform_1(%arg0: i32, %arg1: i32) -> (i32, i32) {
    %c0_i32 = arith.constant 0 : i32
    %c0_i32_0 = arith.constant 0 : i32
    %c0_i32_1 = arith.constant 0 : i32
    return %c0_i32, %c0_i32_0 : i32, i32
  }
  func.func @transform_2(%arg0: i32, %arg1: i32) -> (i32, i32) {
    %c0_i32 = arith.constant 0 : i32
    %c0_i32_0 = arith.constant 0 : i32
    %c0_i32_1 = arith.constant 0 : i32
    return %c0_i32, %c0_i32_0 : i32, i32
  }
  func.func @transform_3(%arg0: i32, %arg1: i32) -> (i32, i32) {
    %c0_i32 = arith.constant 0 : i32
    return %arg0, %arg1 : i32, i32
  }
}

</mosaic_0001>

<bundles_post_ra>
// kernel: classification_head.1
= control target key start
LH: loop header
LB: loop body
LE: loop exit
PB: predicated region body
PF: predicated region fallthrough
CT: control target
= control target key end

     0   :  { %vm16_vm0 = vcmask 261120   ;;  %s227_s0 = inlined_call_operand.vmem [shape: f32[2,8,32], index: 0, kind: input, shape index: {}]   ;;  %s228_s1 = inlined_call_operand.vmem [shape: f32[32,128], index: 1, kind: input, shape index: {}]   ;;  %s229_s2 = inlined_call_operand.vmem [shape: f32[1,128], index: 2, kind: input, shape index: {}]   ;;  %s230_s3 = inlined_call_operand.vmem [shape: f32[8,256], index: 3, kind: output, shape index: {}]  }
   0x1   :  { %v14_v0 = vld [vmem:[%s227_s0] sm:$0xff]  ;;  %v15_v1 = vld [vmem:[%s227_s0 + $0x8] sm:$0xff]  ;;  %v46_v16 = vld [vmem:[%s228_s1 + $0x10] sm:$0xff] }
   0x2   :  { %v17_v2 = vsel %vm16_vm0, %v14_v0, 0.0  ;;  %v20_v3 = vsel %vm16_vm0, %v15_v1, 0.0  ;;  %v44_v14 = vld [vmem:[%s228_s1] sm:$0xff]  ;;  %v45_v15 = vld [vmem:[%s228_s1 + $0x8] sm:$0xff]  ;;  %v47_v18 = vld [vmem:[%s228_s1 + $0x18] sm:$0xff] }
   0x3   :  { %18 = vadd.xlane.f32.xlu0 %v17_v2  ;;  %v162_v17 = vpack.c.bf16 %v45_v15, %v44_v14  ;;  %v166_v19 = vpack.c.bf16 %v47_v18, %v46_v16  ;;  %v142_v30 = vld [vmem:[%s229_s2] ss:$0 sm:$0xff] }
   0x5   :  { %163 = vmatprep.subr.bf16.mxu0 %v162_v17 }
   0x6   :  { %165 = vmatpush3.bf16.msra.mxu0 %v162_v17 }
   0x7   :  { %21 = vadd.xlane.f32.xlu0 %v20_v3  ;;  %167 = vmatprep.subr.bf16.mxu0 %v166_v19 }
   0xa   :  { %169 = vmatpush3.bf16.msra.mxu0 %v166_v19 }
  0x90   :  { %v19_v4 = vpop.xlane.xlu0 %18 }
  0x91   :  { %v24_v5 = vmul.f32 0.03125, %v19_v4 }
  0x93   :  { %v26_v6 = vsub.f32 %v14_v0, %v24_v5 }
  0x94   :  { %v22_v7 = vpop.xlane.xlu0 %21 }
  0x95   :  { %v25_v8 = vmul.f32 0.03125, %v22_v7  ;;  %v28_v9 = vmul.f32 %v26_v6, %v26_v6 }
  0x97   :  { %v27_v10 = vsub.f32 %v15_v1, %v25_v8  ;;  %v30_v11 = vsel %vm16_vm0, %v28_v9, 0.0 }
  0x98   :  { %31 = vadd.xlane.f32.xlu1 %v30_v11 }
  0x99   :  { %v29_v12 = vmul.f32 %v27_v10, %v27_v10 }
  0x9b   :  { %v33_v13 = vsel %vm16_vm0, %v29_v12, 0.0 }
  0x9c   :  { %34 = vadd.xlane.f32.xlu1 %v33_v13 }
 0x125   :  { %v32_v20 = vpop.xlane.xlu1 %31 }
 0x126   :  { %v36_v21 = vmul.f32 0.03125, %v32_v20 }
 0x128   :  { %v38_v22 = vadd.f32 1e-05, %v36_v21 }
 0x129   :  { %v35_v23 = vpop.xlane.xlu1 %34 }
 0x12a   :  { %170 = vrsqrt.f32 %v38_v22  ;;  %v37_v24 = vmul.f32 0.03125, %v35_v23 }
 0x12c   :  { %v39_v25 = vadd.f32 1e-05, %v37_v24 }
 0x12e   :  { %172 = vrsqrt.f32 %v39_v25 }
 0x134   :  { %v171_v26 = vpop.eup %170 }
 0x135   :  { %v42_v27 = vmul.f32 %v171_v26, %v26_v6 }
 0x137   :  { %159 = vmatprep.mubr.msk.f32.mxu0 %vm16_vm0, %v42_v27 }
 0x138   :  { %v173_v28 = vpop.eup %172 }
 0x139   :  { %v43_v29 = vmul.f32 %v173_v28, %v27_v10 }
 0x13b   :  { %160 = vmatmul.mubr.msk.f32.vlgmr.msra.gmra.mrb[0].mxu0 %vm16_vm0, %v43_v29 }
 0x20e   :  { %v161_v31 = vpop.f32.mrb[0].mxu0 }
 0x20f   :  { %v133_v32 = vadd.f32 %v161_v31, %v142_v30  ;;  %v127_v33 = vpop.f32.mrb[1].mxu0 }
 0x210   :  { %v128_v34 = vadd.f32 %v142_v30, %v127_v33 }
 0x211   :  { %137 = vst [vmem:[%s230_s3 + $0x8] sm:$0xff] %v133_v32 }
 0x212   :  { %136 = vst [vmem:[%s230_s3] sm:$0xff] %v128_v34 }

</bundles_post_ra>
